<compile_context>
chip_gen: v7x
topology: tpu7x:2x2x1
jax: 0.10.0
libtpu: 0.0.40
codegen_flags: <defaults>
</compile_context>

<pallas_src>
import functools

import jax
import jax.numpy as jnp
from jax.experimental import pallas as pl
from jax.experimental.pallas import tpu as pltpu


def _cnn1d_kernel(emb_ref, wconv_ref, bconv_ref, wfc_ref, bfc_ref, out_ref,
                  *, L, L_out, E, K, KE_pad):
    # emb_ref   : (TB, L, E)        token embeddings for this batch tile (f32)
    # wconv_ref : (KE_pad, C_out)   conv weight rows ordered (k outer, e inner), zero-padded
    # bconv_ref : (1, C_out)
    # wfc_ref   : (C_out, LP)       fc weight, zero-padded to LP=128 output lanes
    # bfc_ref   : (1, LP)
    # out_ref   : (TB, LP)          lane-dense logits block
    TB = emb_ref.shape[0]
    C_out = wconv_ref.shape[1]
    KE = K * E

    x = emb_ref[...]                                         # (TB, L, E)

    # im2col as a value (stays in vregs; no scratch, no store->load round trip).
    chunks = [x[:, k:k + L_out, :] for k in range(K)]        # K x (TB, L_out, E)
    if KE_pad > KE:
        # Explicit zero pad lanes so the 128-deep contraction is exact (weight pad rows
        # are also zero, and no uninitialized memory is ever read).
        chunks.append(jnp.zeros((TB, L_out, KE_pad - KE), jnp.float32))
    xcol = jnp.concatenate(chunks, axis=-1)                  # (TB, L_out, KE_pad)

    # Conv1d for the whole batch tile as ONE (TB*L_out, KE_pad) @ (KE_pad, C_out) matmul.
    h = jnp.dot(xcol.reshape(TB * L_out, KE_pad), wconv_ref[...],
                preferred_element_type=jnp.float32)          # (TB*L_out, C_out)
    h = jnp.maximum(h + bconv_ref[...], 0.0)                 # bias + ReLU

    # Global max-pool over the output length: one vectorized sublane reduction.
    # Only the L_out valid rows per batch element participate (no pad rows exist).
    pooled = jnp.max(h.reshape(TB, L_out, C_out), axis=1)    # (TB, C_out)

    # TODO(synk): nn.Dropout(0.3) is identity in eval mode; no RNG masking implemented.
    # FC straight from the pooled value into a lane-dense (TB, 128) output store.
    out_ref[...] = (jnp.dot(pooled, wfc_ref[...], preferred_element_type=jnp.float32)
                    + bfc_ref[...])


def basic_cnn1d_forward(tokens, emb_w, conv_w, conv_b, fc_w, fc_b, *, kernel_size):
    """tokens: (B, L) int32.  Returns logits (B, label_size) float32 (eval-mode forward)."""
    B, L = tokens.shape
    C_out, E, K = conv_w.shape
    assert K == kernel_size
    label_size = fc_w.shape[0]
    L_out = L - K + 1
    KE = K * E
    KE_pad = ((KE + 127) // 128) * 128            # contraction depth padded to 128
    LABEL_PAD = ((label_size + 127) // 128) * 128 # lane-dense output width

    # ---- glue (plain JAX): embedding gather + weight packing --------------------------
    # TODO(synk): at large B*L, fuse the gather via scalar-prefetched tokens + in-kernel
    # row DMA; (B, L, E) is already the minimal activation intermediate at these shapes.
    emb = jnp.take(emb_w, tokens, axis=0).astype(jnp.float32)          # (B, L, E)

    # conv weight (C_out, E, K) -> (K, E, C_out) -> (K*E, C_out), zero-pad rows to KE_pad.
    w_conv = jnp.transpose(conv_w, (2, 1, 0)).reshape(KE, C_out).astype(jnp.float32)
    w_conv = jnp.pad(w_conv, ((0, KE_pad - KE), (0, 0)))
    b_conv = conv_b.reshape(1, C_out).astype(jnp.float32)
    # fc weight/bias zero-padded to 128 output lanes (lane-dense kernel store).
    w_fc = jnp.pad(fc_w.T.astype(jnp.float32), ((0, 0), (0, LABEL_PAD - label_size)))
    b_fc = jnp.pad(fc_b.reshape(1, label_size).astype(jnp.float32),
                   ((0, 0), (0, LABEL_PAD - label_size)))

    # Batch tile: whole batch when small; 8-row tiles (sublane aligned) when it scales.
    TB = B if B <= 8 else 8
    grid = (pl.cdiv(B, TB),)

    kernel = functools.partial(_cnn1d_kernel, L=L, L_out=L_out, E=E, K=K, KE_pad=KE_pad)

    out = pl.pallas_call(
        kernel,
        out_shape=jax.ShapeDtypeStruct((B, LABEL_PAD), jnp.float32),
        grid_spec=pltpu.PrefetchScalarGridSpec(
            num_scalar_prefetch=0,
            grid=grid,
            in_specs=[
                pl.BlockSpec((TB, L, E), lambda i: (i, 0, 0)),          # batch-tiled
                pl.BlockSpec((KE_pad, C_out), lambda i: (0, 0)),        # resident weights
                pl.BlockSpec((1, C_out), lambda i: (0, 0)),
                pl.BlockSpec((C_out, LABEL_PAD), lambda i: (0, 0)),
                pl.BlockSpec((1, LABEL_PAD), lambda i: (0, 0)),
            ],
            out_specs=pl.BlockSpec((TB, LABEL_PAD), lambda i: (i, 0)),
        ),
        compiler_params=pltpu.CompilerParams(dimension_semantics=("parallel",)),
    )(emb, w_conv, b_conv, w_fc, b_fc)
    return out[:, :label_size]


def _reference_forward(tokens, emb_w, conv_w, conv_b, fc_w, fc_b, *, kernel_size):
    """Pure-JAX reference matching the PyTorch forward (eval mode)."""
    B, L = tokens.shape
    C_out, E, K = conv_w.shape
    L_out = L - kernel_size + 1
    emb = jnp.take(emb_w, tokens, axis=0)                             # (B, L, E)
    x = jnp.transpose(emb, (0, 2, 1))                                 # (B, E, L)  NCW like PyTorch
    outs = []
    for t in range(L_out):
        window = x[:, :, t:t + K]                                     # (B, E, K)
        outs.append(jnp.einsum('bek,oek->bo', window, conv_w) + conv_b)
    conv = jnp.stack(outs, axis=-1)                                   # (B, C_out, L_out)
    conv = jnp.maximum(conv, 0.0)
    pooled = jnp.max(conv, axis=-1)                                   # (B, C_out)
    return pooled @ fc_w.T + fc_b


if __name__ == "__main__":
    # Small, deterministic config (mirrors opt.*)
    vocab_size = 100
    embedding_dim = 32
    max_seq_len = 16
    kernel_size = 3
    content_dim = 128
    label_size = 8
    batch = 2

    key = jax.random.PRNGKey(0)
    k_emb, k_cw, k_cb, k_fw, k_fb, k_tok = jax.random.split(key, 6)

    emb_w = jax.random.normal(k_emb, (vocab_size, embedding_dim), jnp.float32) * 0.1
    conv_w = jax.random.normal(k_cw, (content_dim, embedding_dim, kernel_size), jnp.float32) * 0.1
    conv_b = jax.random.normal(k_cb, (content_dim,), jnp.float32) * 0.1
    fc_w = jax.random.normal(k_fw, (label_size, content_dim), jnp.float32) * 0.1
    fc_b = jax.random.normal(k_fb, (label_size,), jnp.float32) * 0.1
    tokens = jax.random.randint(k_tok, (batch, max_seq_len), 0, vocab_size, jnp.int32)

    logits = basic_cnn1d_forward(tokens, emb_w, conv_w, conv_b, fc_w, fc_b,
                                 kernel_size=kernel_size)
    logits = jax.block_until_ready(logits)

    ref = _reference_forward(tokens, emb_w, conv_w, conv_b, fc_w, fc_b,
                             kernel_size=kernel_size)
    assert logits.shape == (batch, label_size)
    assert jnp.allclose(logits, ref, atol=1e-4, rtol=1e-4), "mismatch vs reference"
    print("KERNEL_OK")
</pallas_src>

<mosaic_0001>
module attributes {stable_mosaic.version = 11 : i64} {
  func.func @_cnn1d_kernel(%arg0: i32, %arg1: memref<2x16x32xf32, #tpu.memory_space<vmem>>, %arg2: memref<128x128xf32, #tpu.memory_space<vmem>>, %arg3: memref<1x128xf32, #tpu.memory_space<vmem>>, %arg4: memref<128x128xf32, #tpu.memory_space<vmem>>, %arg5: memref<1x128xf32, #tpu.memory_space<vmem>>, %arg6: memref<2x128xf32, #tpu.memory_space<vmem>>) attributes {dimension_semantics = [#tpu.dimension_semantics<parallel>], iteration_bounds = array<i64: 1>, scalar_prefetch = 0 : i64, scratch_operands = 0 : i64, tpu.core_type = #tpu.core_type<tc>, window_params = [{transform_indices = @transform_0, window_bounds = array<i64: 2, 16, 32>}, {pipeline_mode = #tpu.pipeline_mode<synchronous>, transform_indices = @transform_1, window_bounds = array<i64: 128, 128>}, {pipeline_mode = #tpu.pipeline_mode<synchronous>, transform_indices = @transform_2, window_bounds = array<i64: 1, 128>}, {pipeline_mode = #tpu.pipeline_mode<synchronous>, transform_indices = @transform_3, window_bounds = array<i64: 128, 128>}, {pipeline_mode = #tpu.pipeline_mode<synchronous>, transform_indices = @transform_4, window_bounds = array<i64: 1, 128>}, {transform_indices = @transform_5, window_bounds = array<i64: 2, 128>}]} {
    %c0 = arith.constant 0 : index
    %c0_0 = arith.constant 0 : index
    %c0_1 = arith.constant 0 : index
    %0 = vector.load %arg1[%c0, %c0_0, %c0_1] : memref<2x16x32xf32, #tpu.memory_space<vmem>>, vector<2x16x32xf32>
    %1 = vector.extract_strided_slice %0 {offsets = [0, 0, 0], sizes = [2, 14, 32], strides = [1, 1, 1]} : vector<2x16x32xf32> to vector<2x14x32xf32>
    %2 = vector.extract_strided_slice %0 {offsets = [0, 1, 0], sizes = [2, 14, 32], strides = [1, 1, 1]} : vector<2x16x32xf32> to vector<2x14x32xf32>
    %3 = vector.extract_strided_slice %0 {offsets = [0, 2, 0], sizes = [2, 14, 32], strides = [1, 1, 1]} : vector<2x16x32xf32> to vector<2x14x32xf32>
    %cst = arith.constant 0.000000e+00 : f32
    %4 = vector.broadcast %cst : f32 to vector<2x14x32xf32>
    %5 = tpu.concatenate %1, %2, %3, %4 in 2 : vector<2x14x32xf32>, vector<2x14x32xf32>, vector<2x14x32xf32>, vector<2x14x32xf32> -> vector<2x14x128xf32>
    %6 = vector.shape_cast %5 : vector<2x14x128xf32> to vector<28x128xf32>
    %c0_2 = arith.constant 0 : index
    %c0_3 = arith.constant 0 : index
    %7 = vector.load %arg2[%c0_2, %c0_3] : memref<128x128xf32, #tpu.memory_space<vmem>>, vector<128x128xf32>
    %cst_4 = arith.constant dense<0.000000e+00> : vector<28x128xf32>
    %8 = tpu.matmul %6, %7, %cst_4 {dimension_numbers = #tpu.dot_dimension_numbers<[1], [0], [0], [1], [0, 0, 1, 1], [], []>} : vector<28x128xf32>, vector<128x128xf32>, vector<28x128xf32> -> vector<28x128xf32>
    %c0_5 = arith.constant 0 : index
    %c0_6 = arith.constant 0 : index
    %9 = vector.load %arg3[%c0_5, %c0_6] : memref<1x128xf32, #tpu.memory_space<vmem>>, vector<1x128xf32>
    %10 = vector.broadcast %9 : vector<1x128xf32> to vector<28x128xf32>
    %11 = arith.addf %8, %10 : vector<28x128xf32>
    %cst_7 = arith.constant 0.000000e+00 : f32
    %12 = vector.broadcast %cst_7 : f32 to vector<28x128xf32>
    %13 = arith.maximumf %11, %12 : vector<28x128xf32>
    %14 = vector.shape_cast %13 : vector<28x128xf32> to vector<2x14x128xf32>
    %cst_8 = arith.constant dense<0xFF800000> : vector<2x128xf32>
    %15 = vector.multi_reduction <maximumf>, %14, %cst_8 [1] : vector<2x14x128xf32> to vector<2x128xf32>
    %c0_9 = arith.constant 0 : index
    %c0_10 = arith.constant 0 : index
    %16 = vector.load %arg4[%c0_9, %c0_10] : memref<128x128xf32, #tpu.memory_space<vmem>>, vector<128x128xf32>
    %cst_11 = arith.constant dense<0.000000e+00> : vector<2x128xf32>
    %17 = tpu.matmul %15, %16, %cst_11 {dimension_numbers = #tpu.dot_dimension_numbers<[1], [0], [0], [1], [0, 0, 1, 1], [], []>} : vector<2x128xf32>, vector<128x128xf32>, vector<2x128xf32> -> vector<2x128xf32>
    %c0_12 = arith.constant 0 : index
    %c0_13 = arith.constant 0 : index
    %18 = vector.load %arg5[%c0_12, %c0_13] : memref<1x128xf32, #tpu.memory_space<vmem>>, vector<1x128xf32>
    %19 = vector.broadcast %18 : vector<1x128xf32> to vector<2x128xf32>
    %20 = arith.addf %17, %19 : vector<2x128xf32>
    %c0_14 = arith.constant 0 : index
    %c0_15 = arith.constant 0 : index
    %21 = vector.load %arg6[%c0_14, %c0_15] : memref<2x128xf32, #tpu.memory_space<vmem>>, vector<2x128xf32>
    tpu.vector_store %arg6[%c0_14, %c0_15], %20 {strides = array<i32>} : memref<2x128xf32, #tpu.memory_space<vmem>>, vector<2x128xf32>,
    return
  }
  func.func @transform_0(%arg0: i32) -> (i32, i32, i32) {
    %c0_i32 = arith.constant 0 : i32
    %c0_i32_0 = arith.constant 0 : i32
    %c0_i32_1 = arith.constant 0 : i32
    return %arg0, %c0_i32, %c0_i32_0 : i32, i32, i32
  }
  func.func @transform_1(%arg0: i32) -> (i32, i32) {
    %c0_i32 = arith.constant 0 : i32
    %c0_i32_0 = arith.constant 0 : i32
    %c0_i32_1 = arith.constant 0 : i32
    return %c0_i32, %c0_i32_0 : i32, i32
  }
  func.func @transform_2(%arg0: i32) -> (i32, i32) {
    %c0_i32 = arith.constant 0 : i32
    %c0_i32_0 = arith.constant 0 : i32
    %c0_i32_1 = arith.constant 0 : i32
    return %c0_i32, %c0_i32_0 : i32, i32
  }
  func.func @transform_3(%arg0: i32) -> (i32, i32) {
    %c0_i32 = arith.constant 0 : i32
    %c0_i32_0 = arith.constant 0 : i32
    %c0_i32_1 = arith.constant 0 : i32
    return %c0_i32, %c0_i32_0 : i32, i32
  }
  func.func @transform_4(%arg0: i32) -> (i32, i32) {
    %c0_i32 = arith.constant 0 : i32
    %c0_i32_0 = arith.constant 0 : i32
    %c0_i32_1 = arith.constant 0 : i32
    return %c0_i32, %c0_i32_0 : i32, i32
  }
  func.func @transform_5(%arg0: i32) -> (i32, i32) {
    %c0_i32 = arith.constant 0 : i32
    %c0_i32_0 = arith.constant 0 : i32
    return %arg0, %c0_i32 : i32, i32
  }
}

</mosaic_0001>

<bundles_post_ra>
// kernel: tpu_custom_call.1
= control target key start
LH: loop header
LB: loop body
LE: loop exit
PB: predicated region body
PF: predicated region fallthrough
CT: control target
= control target key end

     0   :  { %10 = vsyncpa [#allocation3], 0  ;;  %s1092_s0 = inlined_call_operand.hbm [shape: f32[2,16,32], index: 0, kind: input, shape index: {}]   ;;  %s1093_s1 = inlined_call_operand.hbm [shape: f32[128,128], index: 1, kind: input, shape index: {}]   ;;  %s1094_s2 = inlined_call_operand.vmem [shape: f32[1,128], index: 2, kind: input, shape index: {}]   ;;  %s1095_s3 = inlined_call_operand.hbm [shape: f32[128,128], index: 3, kind: input, shape index: {}]   ;;  %s1096_s4 = inlined_call_operand.vmem [shape: f32[1,128], index: 4, kind: input, shape index: {}]   ;;  %s1097_s5 = inlined_call_operand.hbm [shape: f32[2,128], index: 5, kind: output, shape index: {}]  }
   0x1   :  { %11 = vsyncpa [#allocation6], 0 }
   0x2   :  { %12 = vsyncpa [#allocation4], 0  ;;  %s906_s18 = smov [#allocation5]   ;;  %s907_s20 = smov [#allocation2]  }
   0x3   :  { %s30_s19 = sshll.u32 %s906_s18, 4  ;;  %s18_s21 = sshll.u32 %s907_s20, 4  ;;  %s31_s19 = int_to_ptr.vmem [resolvable:$true] %s30_s19  ;;  %s948_s21 = int_to_ptr.vmem [resolvable:$true] %s18_s21 }
   0x4   :  { %s812_s24 = scalar_lea.hbm %s1093_s1, 2048 }
   0x5   :  { %p813_p0 = scmp.ne.s32.totalorder %s1093_s1, %s812_s24  ;;  %p816_p1 = scmp.lt.u32.totalorder %s812_s24, %s1093_s1 }
   0x7   :  { %p818_p2 = pnand %p816_p1, %p813_p0 }
   0x9   :  { %821 = shalt.err (!%p818_p2)
}
   0xa   :  { %s822_s29 = scalar_lea.vmem %s31_s19, 2048  ;;  %p827_p4 = scmp.lt.s32.totalorder %s31_s19, %s31_s19 }
   0xb   :  { %p823_p3 = scmp.ne.s32.totalorder %s31_s19, %s822_s29  ;;  %p828_p5 = scmp.lt.s32.totalorder %s822_s29, %s822_s29 }
   0xd   :  { %p829_p6 = por %p828_p5, %p827_p4 }
   0xf   :  { %p830_p7 = pnand %p829_p6, %p823_p3 }
  0x11   :  { %833 = shalt.err (!%p830_p7)
}
  0x12   :  { %s908_s30 = smov 128   ;;  %s909_s6 = smov 8  }
  0x13   :  { %36 = dma.hbm_to_vmem [thread:$0]  %s1093_s1, 2048, %s31_s19, [#allocation6], %s908_s30, %s908_s30, %s909_s6  }
  0x14   :  { %s834_s11 = scalar_lea.hbm %s1092_s0, 512 }
  0x15   :  { %p835_p8 = scmp.ne.s32.totalorder %s1092_s0, %s834_s11  ;;  %p838_p9 = scmp.lt.u32.totalorder %s834_s11, %s1092_s0 }
  0x17   :  { %p840_p10 = pnand %p838_p9, %p835_p8 }
  0x19   :  { %843 = shalt.err (!%p840_p10)
}
  0x1a   :  { %s844_s16 = scalar_lea.vmem %s948_s21, 512  ;;  %p849_p12 = scmp.lt.s32.totalorder %s948_s21, %s948_s21 }
  0x1b   :  { %p845_p11 = scmp.ne.s32.totalorder %s948_s21, %s844_s16  ;;  %p850_p13 = scmp.lt.s32.totalorder %s844_s16, %s844_s16 }
  0x1d   :  { %p851_p0 = por %p850_p13, %p849_p12 }
  0x1f   :  { %p852_p1 = pnand %p851_p0, %p845_p11 }
  0x21   :  { %855 = shalt.err (!%p852_p1)
}
  0x22   :  { %24 = dma.hbm_to_vmem [thread:$0]  %s1092_s0, 512, %s948_s21, [#allocation3], %s908_s30, %s908_s30, %s909_s6  }
  0x23   :  { %s910_s18 = smov [#allocation7]   ;;  %s856_s23 = scalar_lea.hbm %s1095_s3, 2048 }
  0x24   :  { %s44_s19 = sshll.u32 %s910_s18, 4  ;;  %p857_p2 = scmp.ne.s32.totalorder %s1095_s3, %s856_s23  ;;  %s45_s19 = int_to_ptr.vmem [resolvable:$true] %s44_s19 }
  0x25   :  { %p860_p3 = scmp.lt.u32.totalorder %s856_s23, %s1095_s3 }
  0x27   :  { %p862_p4 = pnand %p860_p3, %p857_p2 }
  0x29   :  { %865 = shalt.err (!%p862_p4)
}
  0x2a   :  { %s866_s28 = scalar_lea.vmem %s45_s19, 2048  ;;  %p871_p6 = scmp.lt.s32.totalorder %s45_s19, %s45_s19 }
  0x2b   :  { %p867_p5 = scmp.ne.s32.totalorder %s45_s19, %s866_s28  ;;  %p872_p7 = scmp.lt.s32.totalorder %s866_s28, %s866_s28 }
  0x2d   :  { %p873_p8 = por %p872_p7, %p871_p6 }
  0x2f   :  { %p874_p9 = pnand %p873_p8, %p867_p5 }
  0x31   :  { %877 = shalt.err (!%p874_p9)
}
  0x32   :  { %50 = dma.hbm_to_vmem [thread:$0]  %s1095_s3, 2048, %s45_s19, [#allocation6], %s908_s30, %s908_s30, %s909_s6  }
  0x33   :  { %900 = dma.done.wait [#allocation3], 512  }
  0x34   :  { %901 = vsyncadd [#allocation3], 4294966784 }
  0x35   :  { %902 = dma.done.wait [#allocation6], 4096  }
  0x36   :  { %903 = vsyncadd [#allocation6], 4294963200  ;;  %v1000_v0 = vld [vmem:[#allocation2 + $0x8] sm:$0xff]  ;;  %v1002_v1 = vld [vmem:[#allocation2] sm:$0xff]  ;;  %vm70_vm0 = vcmask 1046528   ;;  %vm89_vm1 = vcmask 1045504   ;;  %v131_v42 = vlaneseq }
  0x37   :  { %v1004_v2 = vld [vmem:[#allocation2 + $0x10] sm:$0xff]  ;;  %v72_v3 = vrot.slane %v1000_v0, 1  ;;  %v91_v4 = vrot.slane %v1000_v0, 2  ;;  %v71_v5 = vrot.slane %v1002_v1, 1  ;;  %v1009_v6 = vld [vmem:[#allocation2 + $0x18] sm:$0xff]  ;;  %v193_v8 = vld [vmem:[#allocation5] sm:$0xff] }
  0x38   :  { %v74_v7 = vrot.slane %v1004_v2, 1  ;;  %v75_v9 = vrot.slane %v1009_v6, 1  ;;  %v90_v10 = vrot.slane %v1002_v1, 2  ;;  %v194_v11 = vld [vmem:[#allocation5 + $0x8] sm:$0xff]  ;;  %v195_v12 = vld [vmem:[#allocation5 + $0x10] sm:$0xff]  ;;  %s911_s3 = smov 32  }
  0x39   :  { %79 = vrot.lane.b32.xlu1 %v72_v3, %s911_s3  ;;  %v73_v13 = vsel %vm70_vm0, %v71_v5, %v72_v3  ;;  %v744_v14 = vpack.c.bf16 %v194_v11, %v193_v8  ;;  %v196_v15 = vld [vmem:[#allocation5 + $0x18] sm:$0xff]  ;;  %v93_v17 = vrot.slane %v1004_v2, 2  ;;  %v94_v18 = vrot.slane %v1009_v6, 2  ;;  %v197_v20 = vld [vmem:[#allocation5 + $0x20] sm:$0xff]  ;;  %v198_v21 = vld [vmem:[#allocation5 + $0x28] sm:$0xff]  ;;  %s912_s29 = smov 64  }
  0x3a   :  { %77 = vrot.lane.b32.xlu0 %v73_v13, %s911_s3  ;;  %v76_v16 = vsel %vm70_vm0, %v74_v7, %v75_v9  ;;  %v748_v19 = vpack.c.bf16 %v196_v15, %v195_v12  ;;  %v92_v22 = vsel %vm89_vm1, %v90_v10, %v91_v4  ;;  %v752_v23 = vpack.c.bf16 %v198_v21, %v197_v20  ;;  %v199_v25 = vld [vmem:[#allocation5 + $0x30] sm:$0xff]  ;;  %v200_v26 = vld [vmem:[#allocation5 + $0x38] sm:$0xff]  ;;  %v201_v28 = vld [vmem:[#allocation5 + $0x40] sm:$0xff]  ;;  %s917_s8 = smov [#allocation8]  }
  0x3b   :  { %745 = vmatprep.subr.bf16.mxu0 %v744_v14  ;;  %v95_v24 = vsel %vm89_vm1, %v93_v17, %v94_v18  ;;  %v756_v27 = vpack.c.bf16 %v200_v26, %v199_v25  ;;  %v202_v29 = vld [vmem:[#allocation5 + $0x48] sm:$0xff]  ;;  %v203_v31 = vld [vmem:[#allocation5 + $0x50] sm:$0xff]  ;;  %v204_v32 = vld [vmem:[#allocation5 + $0x58] sm:$0xff]  ;;  %v913_v40 = vmov 1983009808   ;;  %v132_v45 = vshrl.u32 %v131_v42, 7 }
  0x3c   :  { %747 = vmatpush3.bf16.msra.mxu0 %v744_v14  ;;  %v760_v30 = vpack.c.bf16 %v202_v29, %v201_v28  ;;  %v764_v33 = vpack.c.bf16 %v204_v32, %v203_v31  ;;  %v205_v34 = vld [vmem:[#allocation5 + $0x60] sm:$0xff]  ;;  %v206_v35 = vld [vmem:[#allocation5 + $0x68] sm:$0xff]  ;;  %v207_v37 = vld [vmem:[#allocation5 + $0x70] sm:$0xff]  ;;  %v129_v41 = vunpack.c.l.s4 %v913_v40  ;;  %vm108_vm2 = vcmask 261120   ;;  %s622_s9 = sshll.u32 %s917_s8, 4  ;;  %s623_s9 = int_to_ptr.vmem [resolvable:$true] %s622_s9 }
  0x3d   :  { %81 = vrot.lane.b32.xlu1 %v76_v16, %s911_s3  ;;  %749 = vmatprep.subr.bf16.mxu0 %v748_v19  ;;  %v768_v36 = vpack.c.bf16 %v206_v35, %v205_v34  ;;  %v208_v38 = vld [vmem:[#allocation5 + $0x78] sm:$0xff]  ;;  %vm113_vm3 = vcmask 523264   ;;  %vm118_vm4 = vcmask 785408   ;;  %v914_v40 = vmov 0.0|0.0   ;;  %s878_s10 = scalar_lea.vmem %s623_s9, 32  ;;  %p883_p11 = scmp.lt.s32.totalorder %s623_s9, %s623_s9 }
  0x3e   :  { %96 = vrot.lane.b32.xlu0 %v92_v22, %s912_s29  ;;  %v772_v39 = vpack.c.bf16 %v208_v38, %v207_v37  ;;  %v130_v44 = vunpack.c.0.s8 %v129_v41  ;;  %v517_v37 = vld [vmem:[#allocation7] sm:$0xff]  ;;  %v518_v38 = vld [vmem:[#allocation7 + $0x8] sm:$0xff]  ;;  %776 = vmatprep.subr.bf16.mxu1 %v914_v40  ;;  %v519_v41 = vld [vmem:[#allocation7 + $0x10] sm:$0xff]  ;;  %vm915_vm5 = vmmov 0   ;;  %vm542_vm6 = vcmask 1041409   ;;  %p879_p10 = scmp.ne.s32.totalorder %s623_s9, %s878_s10  ;;  %p884_p12 = scmp.lt.s32.totalorder %s878_s10, %s878_s10 }
  0x3f   :  { %v520_v42 = vld [vmem:[#allocation7 + $0x18] sm:$0xff] }
  0x40   :  { %751 = vmatpush3.bf16.msra.mxu0 %v748_v19  ;;  %v1024_v48 = vsub.s32 %v130_v44, %v132_v45  ;;  %v521_v44 = vld [vmem:[#allocation7 + $0x20] sm:$0xff]  ;;  %v522_v45 = vld [vmem:[#allocation7 + $0x28] sm:$0xff]  ;;  %p885_p13 = por %p884_p12, %p883_p11 }
  0x41   :  { %100 = vrot.lane.b32.xlu1 %v95_v24, %s912_s29  ;;  %753 = vmatprep.subr.bf16.mxu0 %v752_v23 }
  0x42   :  { %98 = vrot.lane.b32.xlu0 %v91_v4, %s912_s29  ;;  %p886_p0 = pnand %p885_p13, %p879_p10 }
  0x44   :  { %755 = vmatpush3.bf16.msra.mxu0 %v752_v23 }
  0x45   :  { %102 = vrot.lane.b32.xlu1 %v94_v18, %s912_s29  ;;  %757 = vmatprep.subr.bf16.mxu0 %v756_v27 }
  0x46   :  { %83 = vrot.lane.b32.xlu0 %v75_v9, %s911_s3 }
  0x48   :  { %759 = vmatpush3.bf16.msra.mxu0 %v756_v27 }
  0x49   :  { %761 = vmatprep.subr.bf16.mxu0 %v760_v30 }
  0x4c   :  { %763 = vmatpush3.bf16.msra.mxu0 %v760_v30 }
  0x4d   :  { %765 = vmatprep.subr.bf16.mxu0 %v764_v33 }
  0x50   :  { %767 = vmatpush3.bf16.msra.mxu0 %v764_v33 }
  0x51   :  { %769 = vmatprep.subr.bf16.mxu0 %v768_v36 }
  0x54   :  { %771 = vmatpush3.bf16.msra.mxu0 %v768_v36 }
  0x55   :  { %773 = vmatprep.subr.bf16.mxu0 %v772_v39 }
  0x58   :  { %775 = vmatpush3.bf16.msra.mxu0 %v772_v39  ;;  %v777_v39 = vpack.c.bf16 %v518_v38, %v517_v37 }
  0x5a   :  { %778 = vmatpush3.bf16.msra.mxu1 %v777_v39 }
  0x5b   :  { %779 = vmatprep.subr.bf16.mxu1 %v914_v40 }
  0xab   :  { %v80_v43 = vpop.permute.xlu1 %79 }
  0xac   :  { %v78_v46 = vpop.permute.xlu0 %77  ;;  %v110_v57 = vsel %vm108_vm2, %v1000_v0, %v80_v43  ;;  %v780_v43 = vpack.c.bf16 %v520_v42, %v519_v41 }
  0xad   :  { %v109_v49 = vsel %vm108_vm2, %v1002_v1, %v78_v46  ;;  %v783_v46 = vpack.c.bf16 %v522_v45, %v521_v44 }
  0xae   :  { %781 = vmatpush3.bf16.msra.mxu1 %v780_v43 }
  0xaf   :  { %v82_v47 = vpop.permute.xlu1 %81  ;;  %782 = vmatprep.subr.bf16.mxu1 %v914_v40 }
  0xb0   :  { %v97_v50 = vpop.permute.xlu0 %96  ;;  %v111_v51 = vsel %vm108_vm2, %v1004_v2, %v82_v47  ;;  %v523_v47 = vld [vmem:[#allocation7 + $0x30] sm:$0xff] }
  0xb1   :  { %v114_v52 = vsel %vm113_vm3, %v109_v49, %v97_v50  ;;  %v524_v49 = vld [vmem:[#allocation7 + $0x38] sm:$0xff] }
  0xb2   :  { %v119_v53 = vsel %vm118_vm4, %v114_v52, 0.0  ;;  %784 = vmatpush3.bf16.msra.mxu1 %v783_v46  ;;  %v786_v50 = vpack.c.bf16 %v524_v49, %v523_v47  ;;  %v526_v52 = vld [vmem:[#allocation7 + $0x48] sm:$0xff] }
  0xb3   :  { %v127_v54 = vcombine.high %v119_v53, %v119_v53  ;;  %v134_v55 = vrot.slane %v119_v53, %v1024_v48  ;;  %v101_v56 = vpop.permute.xlu1 %100  ;;  %785 = vmatprep.subr.bf16.mxu1 %v914_v40 }
  0xb4   :  { %v116_v58 = vsel %vm113_vm3, %v111_v51, %v101_v56  ;;  %v99_v59 = vpop.permute.xlu0 %98  ;;  %v525_v51 = vld [vmem:[#allocation7 + $0x40] sm:$0xff] }
  0xb5   :  { %v141_v60 = vrot.slane %v127_v54, %v1024_v48  ;;  %v142_v61 = vcombine.high %v134_v55, %v134_v55  ;;  %v121_v62 = vsel %vm118_vm4, %v116_v58, 0.0  ;;  %v115_v63 = vsel %vm113_vm3, %v110_v57, %v99_v59  ;;  %v527_v54 = vld [vmem:[#allocation7 + $0x50] sm:$0xff]  ;;  %v529_v58 = vld [vmem:[#allocation7 + $0x60] sm:$0xff]  ;;  %v530_v59 = vld [vmem:[#allocation7 + $0x68] sm:$0xff] }
  0xb6   :  { %v160_v1 = vcombine.high %v121_v62, %v121_v62  ;;  %v167_v2 = vrot.slane %v121_v62, %v1024_v48  ;;  %v120_v3 = vsel %vm118_vm4, %v115_v63, 0.0  ;;  %787 = vmatpush3.bf16.msra.mxu1 %v786_v50  ;;  %v789_v53 = vpack.c.bf16 %v526_v52, %v525_v51  ;;  %v532_v62 = vld [vmem:[#allocation7 + $0x78] sm:$0xff] }
  0xb7   :  { %v144_v4 = vcombine.high %v120_v3, %v120_v3  ;;  %v151_v5 = vrot.slane %v120_v3, %v1024_v48  ;;  %v103_v7 = vpop.permute.xlu1 %102  ;;  %v143_v0 = vcombine.high %v141_v60, %v141_v60  ;;  %v216_v8 = vcombine.low %v134_v55, %v142_v61  ;;  %788 = vmatprep.subr.bf16.mxu1 %v914_v40  ;;  %v528_v55 = vld [vmem:[#allocation7 + $0x58] sm:$0xff]  ;;  %v531_v61 = vld [vmem:[#allocation7 + $0x70] sm:$0xff] }
  0xb8   :  { %v174_v9 = vrot.slane %v160_v1, %v1024_v48  ;;  %v175_v10 = vcombine.high %v167_v2, %v167_v2  ;;  %v84_v11 = vpop.permute.xlu0 %83  ;;  %v792_v56 = vpack.c.bf16 %v528_v55, %v527_v54  ;;  %v916_v57 = vmov 0.0   ;;  %v632_v1 = vld [vmem:[%s1094_s2] ss:$0 sm:$0xff] }
  0xb9   :  { %v158_v12 = vrot.slane %v144_v4, %v1024_v48  ;;  %v159_v13 = vcombine.high %v151_v5, %v151_v5  ;;  %v112_v14 = vsel %vm108_vm2, %v1009_v6, %v84_v11  ;;  %v217_v15 = vcombine.low %v141_v60, %v143_v0  ;;  %741 = vmatprep.mubr.msk.f32.mxu1 %vm915_vm5, %v916_v57 }
  0xba   :  { %v117_v16 = vsel %vm113_vm3, %v112_v14, %v103_v7  ;;  %v224_v17 = vrot.slane %v216_v8, %v1024_v48  ;;  %v250_v22 = vcombine.low %v175_v10, %v174_v9  ;;  %v176_v23 = vcombine.high %v174_v9, %v174_v9  ;;  %790 = vmatpush3.bf16.msra.mxu1 %v789_v53 }
  0xbb   :  { %v233_v18 = vcombine.low %v151_v5, %v159_v13  ;;  %v234_v19 = vcombine.low %v158_v12, %v167_v2  ;;  %v122_v20 = vsel %vm118_vm4, %v117_v16, 0.0  ;;  %v231_v21 = vrot.slane %v217_v15, %v1024_v48  ;;  %791 = vmatprep.subr.bf16.mxu1 %v914_v40 }
  0xbc   :  { %v177_v24 = vcombine.high %v122_v20, %v122_v20  ;;  %v184_v25 = vrot.slane %v122_v20, %v1024_v48  ;;  %v258_v32 = vrot.slane %v250_v22, %v1024_v48  ;;  %v795_v60 = vpack.c.bf16 %v530_v59, %v529_v58 }
  0xbd   :  { %v232_v26 = vcombine.low %v224_v17, %v231_v21  ;;  %v241_v27 = vrot.slane %v233_v18, %v1024_v48  ;;  %v248_v6 = vrot.slane %v234_v19, %v1024_v48  ;;  %v798_v63 = vpack.c.bf16 %v532_v62, %v531_v61 }
  0xbe   :  { %v191_v28 = vrot.slane %v177_v24, %v1024_v48  ;;  %v192_v29 = vcombine.high %v184_v25, %v184_v25  ;;  %v251_v30 = vcombine.low %v176_v23, %v184_v25  ;;  %793 = vmatpush3.bf16.msra.mxu1 %v792_v56 }
  0xbf   :  { %703 = vmatprep.mubr.f32.mxu0 %v232_v26  ;;  %v249_v31 = vcombine.low %v241_v27, %v248_v6  ;;  %794 = vmatprep.subr.bf16.mxu1 %v914_v40 }
  0xc0   :  { %v265_v33 = vrot.slane %v251_v30, %v1024_v48  ;;  %v267_v34 = vcombine.low %v192_v29, %v191_v28 }
  0xc1   :  { %704 = vmatmul.mubr.f32.vlgmr.msra.gmra.mrb[0].mxu0 %v249_v31 }
  0xc2   :  { %v266_v35 = vcombine.low %v258_v32, %v265_v33  ;;  %v274_v36 = vrot.slane %v267_v34, %v1024_v48  ;;  %796 = vmatpush3.bf16.msra.mxu1 %v795_v60 }
  0xc3   :  { %797 = vmatprep.subr.bf16.mxu1 %v914_v40 }
  0xc4   :  { %706 = vmatprep.mubr.f32.mxu0 %v266_v35 }
  0xc5   :  { %707 = vmatmul.mubr.f32.gmra.mrb[2].mxu0 %v274_v36 }
  0xc6   :  { %799 = vmatpush3.bf16.msra.mxu1 %v798_v63 }
 0x194   :  { %v705_v2 = vpop.f32.mrb[0].mxu0 }
 0x195   :  { %v351_v3 = vadd.f32 %v705_v2, %v632_v1  ;;  %v345_v4 = vpop.f32.mrb[1].mxu0 }
 0x196   :  { %v346_v5 = vadd.f32 %v632_v1, %v345_v4 }
 0x197   :  { %v365_v7 = vmax.f32 %v351_v3, 0.0 }
 0x198   :  { %v364_v0 = vmax.f32 %v346_v5, 0.0  ;;  %v708_v8 = vpop.f32.mrb[2].mxu0 }
 0x199   :  { %v389_v9 = vcombine.high %v365_v7, %v365_v7  ;;  %v396_v10 = vrot.slane %v365_v7, %v1024_v48  ;;  %v361_v11 = vadd.f32 %v708_v8, %v632_v1  ;;  %v355_v12 = vpop.f32.mrb[3].mxu0 }
 0x19a   :  { %v372_v13 = vcombine.high %v364_v0, %v364_v0  ;;  %v379_v14 = vrot.slane %v364_v0, %v1024_v48  ;;  %v356_v15 = vadd.f32 %v632_v1, %v355_v12 }
 0x19b   :  { %v403_v16 = vrot.slane %v389_v9, %v1024_v48  ;;  %v404_v17 = vcombine.high %v396_v10, %v396_v10  ;;  %v367_v18 = vmax.f32 %v361_v11, 0.0 }
 0x19c   :  { %v386_v19 = vrot.slane %v372_v13, %v1024_v48  ;;  %v387_v20 = vcombine.high %v379_v14, %v379_v14  ;;  %v366_v21 = vmax.f32 %v356_v15, 0.0 }
 0x19d   :  { %v448_v22 = vcombine.low %v396_v10, %v404_v17  ;;  %v429_v23 = vrot.slane %v367_v18, %v1024_v48  ;;  %v405_v24 = vcombine.high %v403_v16, %v403_v16  ;;  %v462_v29 = vrot.slane %v403_v16, %v1024_v48 }
 0x19e   :  { %v388_v25 = vcombine.high %v386_v19, %v386_v19  ;;  %v431_v26 = vcombine.low %v379_v14, %v387_v20  ;;  %v406_v27 = vcombine.high %v366_v21, %v366_v21  ;;  %v413_v6 = vrot.slane %v366_v21, %v1024_v48 }
 0x19f   :  { %v455_v28 = vrot.slane %v448_v22, %v1024_v48  ;;  %v430_v34 = vcombine.high %v429_v23, %v429_v23 }
 0x1a0   :  { %v432_v30 = vcombine.low %v386_v19, %v388_v25  ;;  %v420_v31 = vrot.slane %v406_v27, %v1024_v48  ;;  %v421_v32 = vcombine.high %v413_v6, %v413_v6  ;;  %v464_v35 = vcombine.low %v405_v24, %v413_v6 }
 0x1a1   :  { %v463_v33 = vcombine.low %v455_v28, %v462_v29  ;;  %v439_v36 = vrot.slane %v431_v26, %v1024_v48  ;;  %v495_v46 = vrot.slane %v430_v34, %v1024_v48 }
 0x1a2   :  { %v446_v37 = vrot.slane %v432_v30, %v1024_v48  ;;  %v422_v38 = vcombine.high %v420_v31, %v420_v31  ;;  %v465_v39 = vcombine.low %v421_v32, %v420_v31  ;;  %v472_v41 = vrot.slane %v464_v35, %v1024_v48 }
 0x1a3   :  { %v501_v44 = vsel %vm89_vm1, %v463_v33, -inf }
 0x1a4   :  { %v447_v40 = vcombine.low %v439_v36, %v446_v37  ;;  %v479_v42 = vrot.slane %v465_v39, %v1024_v48  ;;  %v481_v43 = vcombine.low %v422_v38, %v429_v23 }
 0x1a6   :  { %v502_v45 = vmax.f32 %v447_v40, %v501_v44  ;;  %v480_v47 = vcombine.low %v472_v41, %v479_v42  ;;  %v488_v49 = vrot.slane %v481_v43, %v1024_v48  ;;  %v633_v48 = vld [vmem:[%s1096_s4] ss:$0 sm:$0xff] }
 0x1a8   :  { %v496_v50 = vcombine.low %v488_v49, %v495_v46  ;;  %v503_v51 = vrot.slane %v502_v45, 4 }
 0x1aa   :  { %v509_v52 = vsel %vm89_vm1, %v496_v50, -inf  ;;  %v504_v53 = vmax.f32 %v502_v45, %v503_v51 }
 0x1ab   :  { %v510_v54 = vmax.f32 %v480_v47, %v509_v52 }
 0x1ac   :  { %v505_v55 = vrot.slane %v504_v53, 2 }
 0x1ad   :  { %v511_v56 = vrot.slane %v510_v54, 4 }
 0x1ae   :  { %v506_v57 = vmax.f32 %v504_v53, %v505_v55 }
 0x1af   :  { %v512_v58 = vmax.f32 %v510_v54, %v511_v56 }
 0x1b0   :  { %v507_v60 = vrot.slane %v506_v57, 1 }
 0x1b1   :  { %v513_v59 = vrot.slane %v512_v58, 2 }
 0x1b2   :  { %v508_v63 = vmax.f32 %v506_v57, %v507_v60 }
 0x1b3   :  { %v514_v61 = vmax.f32 %v512_v58, %v513_v59 }
 0x1b5   :  { %v515_v62 = vrot.slane %v514_v61, 1 }
 0x1b7   :  { %v516_v1 = vmax.f32 %v514_v61, %v515_v62 }
 0x1b9   :  { %v543_v2 = vsel %vm542_vm6, %v516_v1, %v508_v63 }
 0x1ba   :  { %742 = vmatmul.mubr.f32.vlgmr.msra.gmra.mrb[0].mxu1 %v543_v2 }
 0x28d   :  { %v611_v3 = vpop.f32.mrb[0].mxu1 }
 0x28e   :  { %v612_v4 = vadd.f32 %v633_v48, %v611_v3  ;;  %v743_v5 = vpop.f32.mrb[1].mxu1 }
 0x290   :  { %615 = vst [vmem:[#allocation8] sm:$0x3] %v612_v4 }
 0x291   :  { %889 = shalt.err (!%p886_p0)
}
 0x292   :  { %s890_s13 = scalar_lea.hbm %s1097_s5, 32 }
 0x293   :  { %p891_p1 = scmp.ne.s32.totalorder %s1097_s5, %s890_s13  ;;  %p894_p2 = scmp.lt.u32.totalorder %s890_s13, %s1097_s5 }
 0x295   :  { %p896_p3 = pnand %p894_p2, %p891_p1 }
 0x297   :  { %899 = shalt.err (!%p896_p3)
}
 0x298   :  { %625 = dma.vmem_to_hbm [thread:$0]  %s623_s9, 32, %s1097_s5, [#allocation4]  }
 0x299   :  { %904 = dma.done.wait [#allocation4], 32  }
 0x29a   :  { %905 = vsyncadd [#allocation4], 4294967264 }
 0x29b   :  { %629 = vsyncpa [#allocation3], 1 }
 0x29c   :  { %630 = vsyncpa [#allocation6], 1 }
 0x29d   :  { %631 = vsyncpa [#allocation4], 1 }

</bundles_post_ra>
